<compile_context>
chip_gen: v7x
topology: tpu7x:2x2x1
jax: 0.10.0
libtpu: 0.0.40
codegen_flags: <defaults>
</compile_context>

<pallas_src>
import jax
import jax.numpy as jnp
from jax.experimental import pallas as pl
from jax.experimental.pallas import tpu as pltpu


def mlp_kernel(x_ref, w1_ref, b1_ref, w2_ref, b2_ref, o_ref):
    # x arrives f32 and is cast to bf16 in-kernel (MXU operand); accumulate in
    # f32 and keep bias / ReLU / softmax math in f32.  Output block is
    # lane-dense (tile_b, 128); padded classes carry a -1e30 bias so they
    # contribute exactly 0 to the softmax.
    x = x_ref[...].astype(jnp.bfloat16)
    h = jnp.dot(x, w1_ref[...], preferred_element_type=jnp.float32) + b1_ref[...]  # (T, H) f32
    h = jnp.maximum(h, 0.0)                                                        # ReLU
    logits = jnp.dot(h.astype(w2_ref.dtype), w2_ref[...],
                     preferred_element_type=jnp.float32) + b2_ref[...]             # (T, O_pad) f32
    m = jnp.max(logits, axis=-1, keepdims=True)
    e = jnp.exp(logits - m)
    s = jnp.sum(e, axis=-1, keepdims=True)
    o_ref[...] = (e / s).astype(o_ref.dtype)   # exact normalization (rows sum to 1)


def prepare_simple_mlp_params(w1, b1, w2, b2):
    """One-time weight prep (hoisted out of the per-call hot path).

    w1: (D, H), b1: (H,) or (1, H), w2: (H, O), b2: (O,) or (1, O)
    Returns bf16 weights, f32 biases, class dim padded to a multiple of 128
    lanes with a -1e30 bias on the padded columns.
    """
    D, H = w1.shape
    O = w2.shape[1]
    O_pad = max(128, ((O + 127) // 128) * 128)
    w2p = jnp.zeros((H, O_pad), jnp.float32).at[:, :O].set(w2.astype(jnp.float32))
    b2p = jnp.full((1, O_pad), -1e30, jnp.float32).at[:, :O].set(
        jnp.reshape(b2, (1, O)).astype(jnp.float32))
    return dict(
        w1=w1.astype(jnp.bfloat16),                         # (D, H)    resident
        b1=jnp.reshape(b1, (1, H)).astype(jnp.float32),     # (1, H)    resident
        w2=w2p.astype(jnp.bfloat16),                        # (H, O_pad) resident
        b2=b2p,                                             # (1, O_pad) f32, -1e30 pad bias
        out_dim=O,
    )


def simple_mlp_forward(x, params, *, tile_b=None, out_dtype=None):
    """fc1 -> relu -> fc2 -> softmax(dim=1), fused into one Pallas kernel."""
    B, D = x.shape
    w1b, b1f, w2pb, b2p = params["w1"], params["b1"], params["w2"], params["b2"]
    H = w1b.shape[1]
    O_pad = w2pb.shape[1]
    O = params["out_dim"]
    out_dtype = out_dtype if out_dtype is not None else x.dtype

    # Batch tile: as big as possible (kernel is overhead-bound; per-step cost
    # ~0.35 us >> per-step compute).  VMEM headroom is huge at these dims
    # (resident weights ~40 KiB, ~1.3 KiB/row of streamed + temp state), so
    # even tile_b=4096 stays well under the 16/32 MiB scoped limits on every
    # generation (incl. v7x's 64 MiB physical VMEM).
    # NOTE(v7x): for very large B, cap tile_b so the grid length is an even
    # number >= 2 and dimension_semantics=("parallel",) can use both TensorCores.
    if tile_b is None:
        tile_b = min(B, 4096)
    tile_b = min(tile_b, B)
    tile_b = max(8, ((tile_b + 7) // 8) * 8)      # multiple of 8 sublanes
    grid = (pl.cdiv(B, tile_b),)                  # ragged last block: masked writes, no pad/slice

    cost = pl.CostEstimate(
        flops=2 * B * (D * H + H * O_pad),
        transcendentals=B * O_pad,
        bytes_accessed=(x.size * 4 + w1b.size * 2 + w2pb.size * 2
                        + b1f.size * 4 + b2p.size * 4
                        + B * O_pad * jnp.dtype(out_dtype).itemsize),
    )

    out_padded = pl.pallas_call(
        mlp_kernel,
        out_shape=jax.ShapeDtypeStruct((B, O_pad), out_dtype),
        grid_spec=pl.GridSpec(
            grid=grid,
            in_specs=[
                pl.BlockSpec((tile_b, D), lambda i: (i, 0)),   # x: streams per batch tile (f32)
                pl.BlockSpec((D, H), lambda i: (0, 0)),        # w1: resident in VMEM
                pl.BlockSpec((1, H), lambda i: (0, 0)),        # b1: resident
                pl.BlockSpec((H, O_pad), lambda i: (0, 0)),    # w2 (padded): resident
                pl.BlockSpec((1, O_pad), lambda i: (0, 0)),    # b2 (padded): resident
            ],
            out_specs=pl.BlockSpec((tile_b, O_pad), lambda i: (i, 0)),
        ),
        compiler_params=pltpu.CompilerParams(
            dimension_semantics=("parallel",),   # batch tiles independent (megacore/v7x)
        ),
        cost_estimate=cost,
    )(x, w1b, b1f, w2pb, b2p)

    # drop padded classes (batch dim is already exact)
    return out_padded[:, :O]


if __name__ == "__main__":
    # SimpleMLP(input_dim=32, output_dim=8): fc1 32->128, relu, fc2 128->8, softmax(dim=1)
    B, D, H, O = 256, 32, 128, 8
    key = jax.random.PRNGKey(0)
    kx, k1, kb1, k2, kb2 = jax.random.split(key, 5)

    x = jax.random.normal(kx, (B, D), dtype=jnp.float32)

    # torch.nn.Linear-style init U(-1/sqrt(fan_in), 1/sqrt(fan_in));
    # weights stored (in, out), transposed vs. PyTorch's (out, in).
    bound1 = 1.0 / jnp.sqrt(jnp.float32(D))
    w1 = jax.random.uniform(k1, (D, H), jnp.float32, -bound1, bound1)
    b1 = jax.random.uniform(kb1, (1, H), jnp.float32, -bound1, bound1)
    bound2 = 1.0 / jnp.sqrt(jnp.float32(H))
    w2 = jax.random.uniform(k2, (H, O), jnp.float32, -bound2, bound2)
    b2 = jax.random.uniform(kb2, (1, O), jnp.float32, -bound2, bound2)

    # One-time weight prep, then the fused forward (tile_b defaults to B -> grid=(1,)).
    params = prepare_simple_mlp_params(w1, b1, w2, b2)
    out = simple_mlp_forward(x, params)
    out = jax.block_until_ready(out)
    assert out.shape == (B, O)

    # Reference using the same bf16 MXU operands as the kernel.
    xb, w1b, w2b = (t.astype(jnp.bfloat16) for t in (x, w1, w2))
    h_ref = jnp.maximum(
        jnp.dot(xb, w1b, preferred_element_type=jnp.float32) + b1, 0.0)
    logits_ref = jnp.dot(h_ref.astype(jnp.bfloat16), w2b,
                         preferred_element_type=jnp.float32) + b2
    ref_bf16 = jax.nn.softmax(logits_ref, axis=1)
    assert jnp.max(jnp.abs(out - ref_bf16)) < 2e-3

    # Loose check vs. the pure-f32 forward (bf16 matmul rounding dominates).
    ref_f32 = jax.nn.softmax(jnp.maximum(x @ w1 + b1, 0.0) @ w2 + b2, axis=1)
    assert jnp.max(jnp.abs(out - ref_f32)) < 5e-2

    # Rows sum to 1 (exact divide; padded classes contribute exactly 0).
    assert jnp.max(jnp.abs(jnp.sum(out, axis=1) - 1.0)) < 2e-3

    print("KERNEL_OK")
</pallas_src>

<mosaic_0001>
module attributes {stable_mosaic.version = 11 : i64} {
  func.func @mlp_kernel(%arg0: i32, %arg1: memref<256x32xf32, #tpu.memory_space<vmem>>, %arg2: memref<32x128xbf16, #tpu.memory_space<vmem>>, %arg3: memref<1x128xf32, #tpu.memory_space<vmem>>, %arg4: memref<128x128xbf16, #tpu.memory_space<vmem>>, %arg5: memref<1x128xf32, #tpu.memory_space<vmem>>, %arg6: memref<256x128xf32, #tpu.memory_space<vmem>>) attributes {dimension_semantics = [#tpu.dimension_semantics<parallel>], iteration_bounds = array<i64: 1>, scalar_prefetch = 0 : i64, scratch_operands = 0 : i64, tpu.core_type = #tpu.core_type<tc>, window_params = [{transform_indices = @transform_0, window_bounds = array<i64: 256, 32>}, {pipeline_mode = #tpu.pipeline_mode<synchronous>, transform_indices = @transform_1, window_bounds = array<i64: 32, 128>}, {pipeline_mode = #tpu.pipeline_mode<synchronous>, transform_indices = @transform_2, window_bounds = array<i64: 1, 128>}, {pipeline_mode = #tpu.pipeline_mode<synchronous>, transform_indices = @transform_3, window_bounds = array<i64: 128, 128>}, {pipeline_mode = #tpu.pipeline_mode<synchronous>, transform_indices = @transform_4, window_bounds = array<i64: 1, 128>}, {transform_indices = @transform_5, window_bounds = array<i64: 256, 128>}]} {
    %c0 = arith.constant 0 : index
    %c0_0 = arith.constant 0 : index
    %0 = vector.load %arg1[%c0, %c0_0] : memref<256x32xf32, #tpu.memory_space<vmem>>, vector<256x32xf32>
    %1 = arith.truncf %0 : vector<256x32xf32> to vector<256x32xbf16>
    %c0_1 = arith.constant 0 : index
    %c0_2 = arith.constant 0 : index
    %2 = vector.load %arg2[%c0_1, %c0_2] : memref<32x128xbf16, #tpu.memory_space<vmem>>, vector<32x128xbf16>
    %cst = arith.constant dense<0.000000e+00> : vector<256x128xf32>
    %3 = tpu.matmul %1, %2, %cst {dimension_numbers = #tpu.dot_dimension_numbers<[1], [0], [0], [1], [0, 0, 1, 1], [], []>} : vector<256x32xbf16>, vector<32x128xbf16>, vector<256x128xf32> -> vector<256x128xf32>
    %c0_3 = arith.constant 0 : index
    %c0_4 = arith.constant 0 : index
    %4 = vector.load %arg3[%c0_3, %c0_4] : memref<1x128xf32, #tpu.memory_space<vmem>>, vector<1x128xf32>
    %5 = vector.broadcast %4 : vector<1x128xf32> to vector<256x128xf32>
    %6 = arith.addf %3, %5 : vector<256x128xf32>
    %cst_5 = arith.constant 0.000000e+00 : f32
    %7 = vector.broadcast %cst_5 : f32 to vector<256x128xf32>
    %8 = arith.maximumf %6, %7 : vector<256x128xf32>
    %9 = arith.truncf %8 : vector<256x128xf32> to vector<256x128xbf16>
    %c0_6 = arith.constant 0 : index
    %c0_7 = arith.constant 0 : index
    %10 = vector.load %arg4[%c0_6, %c0_7] : memref<128x128xbf16, #tpu.memory_space<vmem>>, vector<128x128xbf16>
    %cst_8 = arith.constant dense<0.000000e+00> : vector<256x128xf32>
    %11 = tpu.matmul %9, %10, %cst_8 {dimension_numbers = #tpu.dot_dimension_numbers<[1], [0], [0], [1], [0, 0, 1, 1], [], []>} : vector<256x128xbf16>, vector<128x128xbf16>, vector<256x128xf32> -> vector<256x128xf32>
    %c0_9 = arith.constant 0 : index
    %c0_10 = arith.constant 0 : index
    %12 = vector.load %arg5[%c0_9, %c0_10] : memref<1x128xf32, #tpu.memory_space<vmem>>, vector<1x128xf32>
    %13 = vector.broadcast %12 : vector<1x128xf32> to vector<256x128xf32>
    %14 = arith.addf %11, %13 : vector<256x128xf32>
    %cst_11 = arith.constant dense<0xFF800000> : vector<256xf32>
    %15 = vector.multi_reduction <maximumf>, %14, %cst_11 [1] : vector<256x128xf32> to vector<256xf32>
    %16 = vector.shape_cast %15 : vector<256xf32> to vector<256x1xf32>
    %17 = vector.broadcast %16 : vector<256x1xf32> to vector<256x128xf32>
    %18 = arith.subf %14, %17 : vector<256x128xf32>
    %19 = math.exp %18 : vector<256x128xf32>
    %cst_12 = arith.constant dense<0.000000e+00> : vector<256xf32>
    %20 = vector.multi_reduction <add>, %19, %cst_12 [1] : vector<256x128xf32> to vector<256xf32>
    %21 = vector.shape_cast %20 : vector<256xf32> to vector<256x1xf32>
    %22 = vector.broadcast %21 : vector<256x1xf32> to vector<256x128xf32>
    %23 = arith.divf %19, %22 : vector<256x128xf32>
    %c0_13 = arith.constant 0 : index
    %c0_14 = arith.constant 0 : index
    %24 = vector.load %arg6[%c0_13, %c0_14] : memref<256x128xf32, #tpu.memory_space<vmem>>, vector<256x128xf32>
    tpu.vector_store %arg6[%c0_13, %c0_14], %23 {strides = array<i32>} : memref<256x128xf32, #tpu.memory_space<vmem>>, vector<256x128xf32>,
    return
  }
  func.func @transform_0(%arg0: i32) -> (i32, i32) {
    %c0_i32 = arith.constant 0 : i32
    %c0_i32_0 = arith.constant 0 : i32
    return %arg0, %c0_i32 : i32, i32
  }
  func.func @transform_1(%arg0: i32) -> (i32, i32) {
    %c0_i32 = arith.constant 0 : i32
    %c0_i32_0 = arith.constant 0 : i32
    %c0_i32_1 = arith.constant 0 : i32
    return %c0_i32, %c0_i32_0 : i32, i32
  }
  func.func @transform_2(%arg0: i32) -> (i32, i32) {
    %c0_i32 = arith.constant 0 : i32
    %c0_i32_0 = arith.constant 0 : i32
    %c0_i32_1 = arith.constant 0 : i32
    return %c0_i32, %c0_i32_0 : i32, i32
  }
  func.func @transform_3(%arg0: i32) -> (i32, i32) {
    %c0_i32 = arith.constant 0 : i32
    %c0_i32_0 = arith.constant 0 : i32
    %c0_i32_1 = arith.constant 0 : i32
    return %c0_i32, %c0_i32_0 : i32, i32
  }
  func.func @transform_4(%arg0: i32) -> (i32, i32) {
    %c0_i32 = arith.constant 0 : i32
    %c0_i32_0 = arith.constant 0 : i32
    %c0_i32_1 = arith.constant 0 : i32
    return %c0_i32, %c0_i32_0 : i32, i32
  }
  func.func @transform_5(%arg0: i32) -> (i32, i32) {
    %c0_i32 = arith.constant 0 : i32
    %c0_i32_0 = arith.constant 0 : i32
    return %arg0, %c0_i32 : i32, i32
  }
}

</mosaic_0001>

<bundles_post_ra>
// kernel: tpu_custom_call.1
= control target key start
LH: loop header
LB: loop body
LE: loop exit
PB: predicated region body
PF: predicated region fallthrough
CT: control target
= control target key end

     0   :  { %vm93_vm0 = vcmask 261120   ;;  %s1771_s0 = inlined_call_operand.vmem [shape: f32[256,32], index: 0, kind: input, shape index: {}]   ;;  %s1772_s1 = inlined_call_operand.vmem [shape: bf16[32,128], index: 1, kind: input, shape index: {}]   ;;  %s1773_s2 = inlined_call_operand.vmem [shape: f32[1,128], index: 2, kind: input, shape index: {}]   ;;  %s1774_s3 = inlined_call_operand.vmem [shape: bf16[128,128], index: 3, kind: input, shape index: {}]   ;;  %s1775_s4 = inlined_call_operand.vmem [shape: f32[1,128], index: 4, kind: input, shape index: {}]   ;;  %s1776_s5 = inlined_call_operand.hbm [shape: f32[256,128], index: 5, kind: output, shape index: {}]  }
   0x1   :  { %v1092_v0 = vld [vmem:[%s1772_s1] sm:$0xff]   ;;  %v1093_v1 = vld [vmem:[%s1772_s1 + $0x8] sm:$0xff]   ;;  %v24_v5 = vld [vmem:[%s1771_s0 + $0x10] sm:$0xff] }
   0x2   :  { %989 = vmatprep.subr.bf16.mxu0 %v1092_v0  ;;  %v22_v2 = vld [vmem:[%s1771_s0] sm:$0xff]  ;;  %v23_v3 = vld [vmem:[%s1771_s0 + $0x8] sm:$0xff]  ;;  %v25_v6 = vld [vmem:[%s1771_s0 + $0x18] sm:$0xff] }
   0x3   :  { %990 = vmatpush3.bf16.msra.mxu0 %v1092_v0  ;;  %v54_v4 = vpack.c.bf16 %v23_v3, %v22_v2  ;;  %v26_v7 = vld [vmem:[%s1771_s0 + $0x20] sm:$0xff]  ;;  %v27_v8 = vld [vmem:[%s1771_s0 + $0x28] sm:$0xff]  ;;  %v55_v9 = vpack.c.bf16 %v25_v6, %v24_v5  ;;  %v28_v11 = vld [vmem:[%s1771_s0 + $0x30] sm:$0xff] }
   0x4   :  { %991 = vmatprep.subr.bf16.mxu0 %v1093_v1  ;;  %v56_v10 = vpack.c.bf16 %v27_v8, %v26_v7  ;;  %v29_v12 = vld [vmem:[%s1771_s0 + $0x38] sm:$0xff]  ;;  %v30_v13 = vld [vmem:[%s1771_s0 + $0x40] sm:$0xff]  ;;  %v31_v14 = vld [vmem:[%s1771_s0 + $0x48] sm:$0xff] }
   0x5   :  { %993 = vmatprep.mubr.msk.bf16.mxu0 %vm93_vm0, %v54_v4  ;;  %v1094_v15 = vld [vmem:[%s1774_s3] sm:$0xff]   ;;  %v57_v16 = vpack.c.bf16 %v29_v12, %v28_v11  ;;  %v1095_v17 = vld [vmem:[%s1774_s3 + $0x8] sm:$0xff]   ;;  %v58_v18 = vpack.c.bf16 %v31_v14, %v30_v13  ;;  %v32_v19 = vld [vmem:[%s1771_s0 + $0x50] sm:$0xff] }
   0x6   :  { %1073 = vmatprep.subr.bf16.mxu1 %v1094_v15  ;;  %v1096_v20 = vld [vmem:[%s1774_s3 + $0x10] sm:$0xff]   ;;  %v33_v21 = vld [vmem:[%s1771_s0 + $0x58] sm:$0xff]  ;;  %v34_v22 = vld [vmem:[%s1771_s0 + $0x60] sm:$0xff] }
   0x7   :  { %992 = vmatpush3.bf16.msra.mxu0 %v1093_v1  ;;  %1081 = vmatpush3.bf16.msra.mxu1 %v1094_v15  ;;  %v35_v23 = vld [vmem:[%s1771_s0 + $0x68] sm:$0xff] }
   0x8   :  { %1025 = vmatprep.subr.bf16.mxu0 %v1094_v15  ;;  %1074 = vmatprep.subr.bf16.mxu1 %v1095_v17 }
   0xa   :  { %994 = vmatmul.mubr.msk.bf16.vlgmr.msra.gmra.mrb[0].mxu0 %vm93_vm0, %v55_v9 }
   0xb   :  { %997 = vmatprep.mubr.msk.bf16.mxu0 %vm93_vm0, %v56_v10  ;;  %1026 = vmatpush3.bf16.msra.mxu0 %v1094_v15 }
   0xc   :  { %1027 = vmatprep.subr.bf16.mxu0 %v1095_v17  ;;  %1082 = vmatpush3.bf16.msra.mxu1 %v1095_v17 }
   0xf   :  { %1028 = vmatpush3.bf16.msra.mxu0 %v1095_v17 }
  0x12   :  { %998 = vmatmul.mubr.msk.bf16.gmra.mrb[4].mxu0 %vm93_vm0, %v57_v16 }
  0x13   :  { %1001 = vmatprep.mubr.msk.bf16.mxu0 %vm93_vm0, %v58_v18 }
  0x14   :  { %10 = vsyncpa [#allocation3], 0  ;;  %1029 = vmatprep.subr.bf16.mxu0 %v1096_v20  ;;  %v1097_v24 = vld [vmem:[%s1774_s3 + $0x18] sm:$0xff]   ;;  %1075 = vmatprep.subr.bf16.mxu1 %v1096_v20  ;;  %v59_v25 = vpack.c.bf16 %v33_v21, %v32_v19  ;;  %v60_v26 = vpack.c.bf16 %v35_v23, %v34_v22  ;;  %v1098_v27 = vld [vmem:[%s1774_s3 + $0x20] sm:$0xff]  }
  0x15   :  { %1030 = vmatpush3.bf16.msra.mxu0 %v1096_v20  ;;  %1083 = vmatpush3.bf16.msra.mxu1 %v1096_v20  ;;  %v36_v28 = vld [vmem:[%s1771_s0 + $0x70] sm:$0xff]  ;;  %v37_v29 = vld [vmem:[%s1771_s0 + $0x78] sm:$0xff]  ;;  %v38_v30 = vld [vmem:[%s1771_s0 + $0x80] sm:$0xff] }
  0x16   :  { %1031 = vmatprep.subr.bf16.mxu0 %v1097_v24  ;;  %1076 = vmatprep.subr.bf16.mxu1 %v1097_v24  ;;  %v39_v31 = vld [vmem:[%s1771_s0 + $0x88] sm:$0xff]  ;;  %v61_v33 = vpack.c.bf16 %v37_v29, %v36_v28  ;;  %v1100_v35 = vld [vmem:[%s1774_s3 + $0x30] sm:$0xff]   ;;  %v41_v37 = vld [vmem:[%s1771_s0 + $0x98] sm:$0xff] }
  0x17   :  { %v1099_v32 = vld [vmem:[%s1774_s3 + $0x28] sm:$0xff]   ;;  %v62_v34 = vpack.c.bf16 %v39_v31, %v38_v30  ;;  %v40_v36 = vld [vmem:[%s1771_s0 + $0x90] sm:$0xff]  ;;  %v42_v38 = vld [vmem:[%s1771_s0 + $0xa0] sm:$0xff] }
  0x18   :  { %v43_v39 = vld [vmem:[%s1771_s0 + $0xa8] sm:$0xff]  ;;  %v63_v40 = vpack.c.bf16 %v41_v37, %v40_v36  ;;  %v44_v42 = vld [vmem:[%s1771_s0 + $0xb0] sm:$0xff]  ;;  %v45_v43 = vld [vmem:[%s1771_s0 + $0xb8] sm:$0xff] }
  0x19   :  { %1032 = vmatpush3.bf16.msra.mxu0 %v1097_v24  ;;  %1084 = vmatpush3.bf16.msra.mxu1 %v1097_v24  ;;  %v64_v41 = vpack.c.bf16 %v43_v39, %v42_v38  ;;  %v46_v44 = vld [vmem:[%s1771_s0 + $0xc0] sm:$0xff]  ;;  %v47_v45 = vld [vmem:[%s1771_s0 + $0xc8] sm:$0xff]  ;;  %v65_v46 = vpack.c.bf16 %v45_v43, %v44_v42  ;;  %v48_v48 = vld [vmem:[%s1771_s0 + $0xd0] sm:$0xff] }
  0x1a   :  { %1002 = vmatmul.mubr.msk.bf16.gmra.mrb[8].mxu0 %vm93_vm0, %v59_v25  ;;  %1033 = vmatprep.subr.bf16.mxu0 %v1098_v27  ;;  %v66_v47 = vpack.c.bf16 %v47_v45, %v46_v44  ;;  %v49_v49 = vld [vmem:[%s1771_s0 + $0xd8] sm:$0xff]  ;;  %v50_v50 = vld [vmem:[%s1771_s0 + $0xe0] sm:$0xff]  ;;  %v51_v51 = vld [vmem:[%s1771_s0 + $0xe8] sm:$0xff] }
  0x1b   :  { %1005 = vmatprep.mubr.msk.bf16.mxu0 %vm93_vm0, %v60_v26  ;;  %1077 = vmatprep.subr.bf16.mxu1 %v1098_v27  ;;  %v67_v52 = vpack.c.bf16 %v49_v49, %v48_v48  ;;  %v68_v53 = vpack.c.bf16 %v51_v51, %v50_v50  ;;  %v52_v54 = vld [vmem:[%s1771_s0 + $0xf0] sm:$0xff]  ;;  %v53_v55 = vld [vmem:[%s1771_s0 + $0xf8] sm:$0xff]  ;;  %v1432_v58 = vld [vmem:[%s1773_s2] ss:$0 sm:$0xff] }
  0x1c   :  { %v69_v56 = vpack.c.bf16 %v53_v55, %v52_v54  ;;  %v1101_v57 = vld [vmem:[%s1774_s3 + $0x38] sm:$0xff]   ;;  %s1254_s3 = smov [#allocation2]  }
  0x1d   :  { %1034 = vmatpush3.bf16.msra.mxu0 %v1098_v27  ;;  %1085 = vmatpush3.bf16.msra.mxu1 %v1098_v27 }
  0x1e   :  { %1035 = vmatprep.subr.bf16.mxu0 %v1099_v32  ;;  %1078 = vmatprep.subr.bf16.mxu1 %v1099_v32 }
  0x21   :  { %1036 = vmatpush3.bf16.msra.mxu0 %v1099_v32  ;;  %1086 = vmatpush3.bf16.msra.mxu1 %v1099_v32 }
  0x22   :  { %1006 = vmatmul.mubr.msk.bf16.gmra.mrb[12].mxu0 %vm93_vm0, %v61_v33  ;;  %1037 = vmatprep.subr.bf16.mxu0 %v1100_v35 }
  0x23   :  { %1009 = vmatprep.mubr.msk.bf16.mxu0 %vm93_vm0, %v62_v34  ;;  %1079 = vmatprep.subr.bf16.mxu1 %v1100_v35 }
  0x25   :  { %1038 = vmatpush3.bf16.msra.mxu0 %v1100_v35  ;;  %1087 = vmatpush3.bf16.msra.mxu1 %v1100_v35 }
  0x26   :  { %1039 = vmatprep.subr.bf16.mxu0 %v1101_v57  ;;  %1080 = vmatprep.subr.bf16.mxu1 %v1101_v57 }
  0x29   :  { %1040 = vmatpush3.bf16.msra.mxu0 %v1101_v57  ;;  %1088 = vmatpush3.bf16.msra.mxu1 %v1101_v57 }
  0x2a   :  { %1010 = vmatmul.mubr.msk.bf16.gmra.mrb[16].mxu0 %vm93_vm0, %v63_v40 }
  0x2b   :  { %1013 = vmatprep.mubr.msk.bf16.mxu0 %vm93_vm0, %v64_v41 }
  0x32   :  { %1014 = vmatmul.mubr.msk.bf16.gmra.mrb[20].mxu0 %vm93_vm0, %v65_v46 }
  0x33   :  { %1017 = vmatprep.mubr.msk.bf16.mxu0 %vm93_vm0, %v66_v47 }
  0x3a   :  { %1018 = vmatmul.mubr.msk.bf16.gmra.mrb[24].mxu0 %vm93_vm0, %v67_v52 }
  0x3b   :  { %1021 = vmatprep.mubr.msk.bf16.mxu0 %vm93_vm0, %v68_v53 }
  0x42   :  { %1022 = vmatmul.mubr.msk.bf16.gmra.mrb[28].mxu0 %vm93_vm0, %v69_v56 }
  0xdd   :  { %v995_v59 = vpop.f32.mrb[0].mxu0 }
  0xde   :  { %v185_v60 = vadd.f32 %v995_v59, %v1432_v58  ;;  %v176_v61 = vpop.f32.mrb[1].mxu0 }
  0xdf   :  { %v177_v62 = vadd.f32 %v1432_v58, %v176_v61  ;;  %v996_v63 = vpop.f32.mrb[2].mxu0 }
  0xe0   :  { %v188_v0 = vadd.f32 %v996_v63, %v1432_v58  ;;  %v179_v1 = vpop.f32.mrb[3].mxu0  ;;  %v305_v3 = vmax.f32 %v185_v60, 0.0 }
  0xe1   :  { %v180_v2 = vadd.f32 %v1432_v58, %v179_v1  ;;  %v303_v5 = vmax.f32 %v177_v62, 0.0 }
  0xe2   :  { %v306_v4 = vmax.f32 %v188_v0, 0.0 }
  0xe3   :  { %v304_v6 = vmax.f32 %v180_v2, 0.0 }
  0xe4   :  { %v336_v7 = vpack.c.bf16 %v306_v4, %v305_v3 }
  0xe5   :  { %v335_v8 = vpack.c.bf16 %v304_v6, %v303_v5  ;;  %v999_v9 = vpop.f32.mrb[4].mxu0 }
  0xe6   :  { %v201_v10 = vadd.f32 %v999_v9, %v1432_v58  ;;  %v192_v11 = vpop.f32.mrb[5].mxu0 }
  0xe7   :  { %v193_v12 = vadd.f32 %v1432_v58, %v192_v11  ;;  %v1000_v13 = vpop.f32.mrb[6].mxu0  ;;  %1041 = vmatprep.mubr.bf16.mxu0 %v335_v8 }
  0xe8   :  { %v309_v14 = vmax.f32 %v201_v10, 0.0  ;;  %v204_v15 = vadd.f32 %v1000_v13, %v1432_v58  ;;  %v195_v16 = vpop.f32.mrb[7].mxu0  ;;  %1042 = vmatmul.mubr.bf16.vlgmr.msra.gmra.mrb[32].mxu0 %v336_v7 }
  0xe9   :  { %v196_v17 = vadd.f32 %v1432_v58, %v195_v16  ;;  %v307_v19 = vmax.f32 %v193_v12, 0.0 }
  0xea   :  { %v310_v18 = vmax.f32 %v204_v15, 0.0 }
  0xeb   :  { %v308_v20 = vmax.f32 %v196_v17, 0.0 }
  0xec   :  { %v338_v21 = vpack.c.bf16 %v310_v18, %v309_v14 }
  0xed   :  { %v1003_v22 = vpop.f32.mrb[8].mxu0  ;;  %v337_v23 = vpack.c.bf16 %v308_v20, %v307_v19 }
  0xee   :  { %v217_v24 = vadd.f32 %v1003_v22, %v1432_v58  ;;  %v208_v25 = vpop.f32.mrb[9].mxu0 }
  0xef   :  { %v209_v26 = vadd.f32 %v1432_v58, %v208_v25  ;;  %v1004_v27 = vpop.f32.mrb[10].mxu0  ;;  %1045 = vmatprep.mubr.bf16.mxu1 %v337_v23 }
  0xf0   :  { %v313_v28 = vmax.f32 %v217_v24, 0.0  ;;  %v220_v29 = vadd.f32 %v1004_v27, %v1432_v58  ;;  %v211_v30 = vpop.f32.mrb[11].mxu0  ;;  %1046 = vmatmul.mubr.bf16.vlgmr.msra.gmra.mrb[0].mxu1 %v338_v21 }
  0xf1   :  { %v212_v31 = vadd.f32 %v1432_v58, %v211_v30  ;;  %v311_v33 = vmax.f32 %v209_v26, 0.0 }
  0xf2   :  { %v314_v32 = vmax.f32 %v220_v29, 0.0 }
  0xf3   :  { %v312_v34 = vmax.f32 %v212_v31, 0.0 }
  0xf4   :  { %v340_v35 = vpack.c.bf16 %v314_v32, %v313_v28 }
  0xf5   :  { %v339_v36 = vpack.c.bf16 %v312_v34, %v311_v33  ;;  %v1007_v37 = vpop.f32.mrb[12].mxu0 }
  0xf6   :  { %v233_v38 = vadd.f32 %v1007_v37, %v1432_v58  ;;  %v224_v39 = vpop.f32.mrb[13].mxu0 }
  0xf7   :  { %v225_v40 = vadd.f32 %v1432_v58, %v224_v39  ;;  %v1008_v41 = vpop.f32.mrb[14].mxu0  ;;  %1049 = vmatprep.mubr.bf16.mxu1 %v339_v36 }
  0xf8   :  { %v317_v42 = vmax.f32 %v233_v38, 0.0  ;;  %v236_v43 = vadd.f32 %v1008_v41, %v1432_v58  ;;  %v227_v44 = vpop.f32.mrb[15].mxu0  ;;  %1050 = vmatmul.mubr.bf16.gmra.mrb[4].mxu1 %v340_v35 }
  0xf9   :  { %v228_v45 = vadd.f32 %v1432_v58, %v227_v44  ;;  %v315_v47 = vmax.f32 %v225_v40, 0.0  ;;  %v1469_v44 = vld [vmem:[%s1775_s4] ss:$0 sm:$0xff]  ;;  %s908_s4 = sshll.u32 %s1254_s3, 4  ;;  %s909_s4 = int_to_ptr.vmem [resolvable:$true] %s908_s4 }
  0xfa   :  { %v318_v46 = vmax.f32 %v236_v43, 0.0  ;;  %s1230_s26 = scalar_lea.vmem %s909_s4, 4096  ;;  %p1235_p1 = scmp.lt.s32.totalorder %s909_s4, %s909_s4 }
  0xfb   :  { %v316_v48 = vmax.f32 %v228_v45, 0.0  ;;  %p1231_p0 = scmp.ne.s32.totalorder %s909_s4, %s1230_s26  ;;  %p1236_p2 = scmp.lt.s32.totalorder %s1230_s26, %s1230_s26 }
  0xfc   :  { %v342_v49 = vpack.c.bf16 %v318_v46, %v317_v42 }
  0xfd   :  { %v341_v50 = vpack.c.bf16 %v316_v48, %v315_v47  ;;  %v1011_v51 = vpop.f32.mrb[16].mxu0  ;;  %p1237_p3 = por %p1236_p2, %p1235_p1 }
  0xfe   :  { %v249_v52 = vadd.f32 %v1011_v51, %v1432_v58  ;;  %v240_v53 = vpop.f32.mrb[17].mxu0 }
  0xff   :  { %v241_v54 = vadd.f32 %v1432_v58, %v240_v53  ;;  %v1012_v55 = vpop.f32.mrb[18].mxu0  ;;  %1053 = vmatprep.mubr.bf16.mxu1 %v341_v50  ;;  %p1238_p4 = pnand %p1237_p3, %p1231_p0 }
 0x100   :  { %v321_v56 = vmax.f32 %v249_v52, 0.0  ;;  %v252_v57 = vadd.f32 %v1012_v55, %v1432_v58  ;;  %v243_v59 = vpop.f32.mrb[19].mxu0  ;;  %1054 = vmatmul.mubr.bf16.gmra.mrb[8].mxu1 %v342_v49 }
 0x101   :  { %v244_v60 = vadd.f32 %v1432_v58, %v243_v59  ;;  %v319_v62 = vmax.f32 %v241_v54, 0.0 }
 0x102   :  { %v322_v61 = vmax.f32 %v252_v57, 0.0 }
 0x103   :  { %v320_v63 = vmax.f32 %v244_v60, 0.0 }
 0x104   :  { %v344_v0 = vpack.c.bf16 %v322_v61, %v321_v56 }
 0x105   :  { %v343_v1 = vpack.c.bf16 %v320_v63, %v319_v62  ;;  %v1015_v2 = vpop.f32.mrb[20].mxu0 }
 0x106   :  { %v265_v3 = vadd.f32 %v1015_v2, %v1432_v58  ;;  %v256_v4 = vpop.f32.mrb[21].mxu0 }
 0x107   :  { %v257_v5 = vadd.f32 %v1432_v58, %v256_v4  ;;  %v1016_v6 = vpop.f32.mrb[22].mxu0  ;;  %1057 = vmatprep.mubr.bf16.mxu1 %v343_v1 }
 0x108   :  { %v325_v7 = vmax.f32 %v265_v3, 0.0  ;;  %v268_v8 = vadd.f32 %v1016_v6, %v1432_v58  ;;  %v259_v9 = vpop.f32.mrb[23].mxu0  ;;  %1058 = vmatmul.mubr.bf16.gmra.mrb[12].mxu1 %v344_v0 }
 0x109   :  { %v260_v10 = vadd.f32 %v1432_v58, %v259_v9  ;;  %v323_v12 = vmax.f32 %v257_v5, 0.0 }
 0x10a   :  { %v326_v11 = vmax.f32 %v268_v8, 0.0 }
 0x10b   :  { %v324_v13 = vmax.f32 %v260_v10, 0.0 }
 0x10c   :  { %v346_v14 = vpack.c.bf16 %v326_v11, %v325_v7 }
 0x10d   :  { %v345_v15 = vpack.c.bf16 %v324_v13, %v323_v12  ;;  %v1019_v16 = vpop.f32.mrb[24].mxu0 }
 0x10e   :  { %v281_v17 = vadd.f32 %v1019_v16, %v1432_v58  ;;  %v272_v18 = vpop.f32.mrb[25].mxu0 }
 0x10f   :  { %v273_v19 = vadd.f32 %v1432_v58, %v272_v18  ;;  %v1020_v20 = vpop.f32.mrb[26].mxu0  ;;  %1061 = vmatprep.mubr.bf16.mxu1 %v345_v15 }
 0x110   :  { %v329_v21 = vmax.f32 %v281_v17, 0.0  ;;  %v284_v22 = vadd.f32 %v1020_v20, %v1432_v58  ;;  %v275_v23 = vpop.f32.mrb[27].mxu0  ;;  %1062 = vmatmul.mubr.bf16.gmra.mrb[16].mxu1 %v346_v14 }
 0x111   :  { %v276_v24 = vadd.f32 %v1432_v58, %v275_v23  ;;  %v327_v26 = vmax.f32 %v273_v19, 0.0 }
 0x112   :  { %v330_v25 = vmax.f32 %v284_v22, 0.0 }
 0x113   :  { %v328_v27 = vmax.f32 %v276_v24, 0.0 }
 0x114   :  { %v348_v28 = vpack.c.bf16 %v330_v25, %v329_v21 }
 0x115   :  { %v347_v29 = vpack.c.bf16 %v328_v27, %v327_v26  ;;  %v1023_v30 = vpop.f32.mrb[28].mxu0 }
 0x116   :  { %v297_v31 = vadd.f32 %v1023_v30, %v1432_v58  ;;  %v288_v32 = vpop.f32.mrb[29].mxu0 }
 0x117   :  { %v289_v33 = vadd.f32 %v1432_v58, %v288_v32  ;;  %v1024_v34 = vpop.f32.mrb[30].mxu0  ;;  %1065 = vmatprep.mubr.bf16.mxu1 %v347_v29 }
 0x118   :  { %v333_v35 = vmax.f32 %v297_v31, 0.0  ;;  %v300_v36 = vadd.f32 %v1024_v34, %v1432_v58  ;;  %v291_v37 = vpop.f32.mrb[31].mxu0  ;;  %1066 = vmatmul.mubr.bf16.gmra.mrb[20].mxu1 %v348_v28 }
 0x119   :  { %v292_v38 = vadd.f32 %v1432_v58, %v291_v37  ;;  %v331_v40 = vmax.f32 %v289_v33, 0.0 }
 0x11a   :  { %v334_v39 = vmax.f32 %v300_v36, 0.0 }
 0x11b   :  { %v332_v41 = vmax.f32 %v292_v38, 0.0 }
 0x11c   :  { %v350_v42 = vpack.c.bf16 %v334_v39, %v333_v35 }
 0x11d   :  { %v349_v43 = vpack.c.bf16 %v332_v41, %v331_v40 }
 0x11f   :  { %1069 = vmatprep.mubr.bf16.mxu1 %v349_v43 }
 0x120   :  { %1070 = vmatmul.mubr.bf16.gmra.mrb[24].mxu1 %v350_v42 }
 0x1bb   :  { %v1043_v45 = vpop.f32.mrb[32].mxu0 }
 0x1bc   :  { %v1472_v46 = vadd.f32 %v1043_v45, %v1469_v44  ;;  %v456_v47 = vpop.f32.mrb[33].mxu0 }
 0x1bd   :  { %v1475_v48 = vadd.f32 %v1469_v44, %v456_v47  ;;  %v1044_v58 = vpop.f32.mrb[34].mxu0 }
 0x1be   :  { %587 = vmax.xlane.f32.xlu1 %v1472_v46  ;;  %v459_v49 = vpop.f32.mrb[35].mxu0  ;;  %v1480_v50 = vadd.f32 %v1044_v58, %v1469_v44 }
 0x1bf   :  { %583 = vmax.xlane.f32.xlu0 %v1475_v48  ;;  %v1483_v51 = vadd.f32 %v1469_v44, %v459_v49 }
 0x1c2   :  { %589 = vmax.xlane.f32.xlu1 %v1480_v50 }
 0x1c3   :  { %v1047_v52 = vpop.f32.mrb[0].mxu1  ;;  %585 = vmax.xlane.f32.xlu0 %v1483_v51 }
 0x1c4   :  { %v1488_v53 = vadd.f32 %v1047_v52, %v1469_v44  ;;  %v472_v54 = vpop.f32.mrb[1].mxu1 }
 0x1c5   :  { %v1048_v55 = vpop.f32.mrb[2].mxu1  ;;  %v1496_v59 = vadd.f32 %v1469_v44, %v472_v54 }
 0x1c6   :  { %v1491_v56 = vadd.f32 %v1048_v55, %v1469_v44  ;;  %v475_v57 = vpop.f32.mrb[3].mxu1 }
 0x1c7   :  { %595 = vmax.xlane.f32.xlu0 %v1488_v53  ;;  %v1499_v60 = vadd.f32 %v1469_v44, %v475_v57 }
 0x1c8   :  { %597 = vmax.xlane.f32.xlu1 %v1491_v56 }
 0x1cb   :  { %v1051_v61 = vpop.f32.mrb[4].mxu1  ;;  %591 = vmax.xlane.f32.xlu0 %v1496_v59 }
 0x1cc   :  { %v1503_v62 = vadd.f32 %v1051_v61, %v1469_v44  ;;  %v488_v63 = vpop.f32.mrb[5].mxu1  ;;  %593 = vmax.xlane.f32.xlu1 %v1499_v60 }
 0x1cd   :  { %v1052_v0 = vpop.f32.mrb[6].mxu1  ;;  %v1512_v3 = vadd.f32 %v1469_v44, %v488_v63 }
 0x1ce   :  { %v1507_v1 = vadd.f32 %v1052_v0, %v1469_v44  ;;  %v491_v2 = vpop.f32.mrb[7].mxu1 }
 0x1cf   :  { %603 = vmax.xlane.f32.xlu0 %v1503_v62  ;;  %v1515_v4 = vadd.f32 %v1469_v44, %v491_v2 }
 0x1d0   :  { %605 = vmax.xlane.f32.xlu1 %v1507_v1 }
 0x1d3   :  { %v1055_v5 = vpop.f32.mrb[8].mxu1  ;;  %599 = vmax.xlane.f32.xlu0 %v1512_v3 }
 0x1d4   :  { %v1519_v6 = vadd.f32 %v1055_v5, %v1469_v44  ;;  %v504_v7 = vpop.f32.mrb[9].mxu1  ;;  %601 = vmax.xlane.f32.xlu1 %v1515_v4 }
 0x1d5   :  { %v1056_v8 = vpop.f32.mrb[10].mxu1  ;;  %v1528_v11 = vadd.f32 %v1469_v44, %v504_v7 }
 0x1d6   :  { %v1523_v9 = vadd.f32 %v1056_v8, %v1469_v44  ;;  %v507_v10 = vpop.f32.mrb[11].mxu1 }
 0x1d7   :  { %611 = vmax.xlane.f32.xlu0 %v1519_v6  ;;  %v1531_v12 = vadd.f32 %v1469_v44, %v507_v10 }
 0x1d8   :  { %613 = vmax.xlane.f32.xlu1 %v1523_v9 }
 0x1db   :  { %v1059_v13 = vpop.f32.mrb[12].mxu1  ;;  %607 = vmax.xlane.f32.xlu0 %v1528_v11 }
 0x1dc   :  { %v1535_v14 = vadd.f32 %v1059_v13, %v1469_v44  ;;  %v520_v15 = vpop.f32.mrb[13].mxu1  ;;  %609 = vmax.xlane.f32.xlu1 %v1531_v12 }
 0x1dd   :  { %v1060_v16 = vpop.f32.mrb[14].mxu1  ;;  %v1544_v19 = vadd.f32 %v1469_v44, %v520_v15 }
 0x1de   :  { %v1539_v17 = vadd.f32 %v1060_v16, %v1469_v44  ;;  %v523_v18 = vpop.f32.mrb[15].mxu1 }
 0x1df   :  { %619 = vmax.xlane.f32.xlu0 %v1535_v14  ;;  %v1547_v20 = vadd.f32 %v1469_v44, %v523_v18 }
 0x1e0   :  { %621 = vmax.xlane.f32.xlu1 %v1539_v17 }
 0x1e3   :  { %v1063_v21 = vpop.f32.mrb[16].mxu1  ;;  %615 = vmax.xlane.f32.xlu0 %v1544_v19 }
 0x1e4   :  { %v1551_v22 = vadd.f32 %v1063_v21, %v1469_v44  ;;  %v536_v23 = vpop.f32.mrb[17].mxu1  ;;  %617 = vmax.xlane.f32.xlu1 %v1547_v20 }
 0x1e5   :  { %v1064_v24 = vpop.f32.mrb[18].mxu1  ;;  %v1560_v27 = vadd.f32 %v1469_v44, %v536_v23 }
 0x1e6   :  { %v1555_v25 = vadd.f32 %v1064_v24, %v1469_v44  ;;  %v539_v26 = vpop.f32.mrb[19].mxu1 }
 0x1e7   :  { %627 = vmax.xlane.f32.xlu0 %v1551_v22  ;;  %v1563_v28 = vadd.f32 %v1469_v44, %v539_v26 }
 0x1e8   :  { %629 = vmax.xlane.f32.xlu1 %v1555_v25 }
 0x1eb   :  { %v1067_v29 = vpop.f32.mrb[20].mxu1  ;;  %623 = vmax.xlane.f32.xlu0 %v1560_v27 }
 0x1ec   :  { %v1567_v30 = vadd.f32 %v1067_v29, %v1469_v44  ;;  %v552_v31 = vpop.f32.mrb[21].mxu1  ;;  %625 = vmax.xlane.f32.xlu1 %v1563_v28 }
 0x1ed   :  { %v1068_v32 = vpop.f32.mrb[22].mxu1  ;;  %v1576_v35 = vadd.f32 %v1469_v44, %v552_v31 }
 0x1ee   :  { %v1571_v33 = vadd.f32 %v1068_v32, %v1469_v44  ;;  %v555_v34 = vpop.f32.mrb[23].mxu1 }
 0x1ef   :  { %635 = vmax.xlane.f32.xlu0 %v1567_v30  ;;  %v1579_v36 = vadd.f32 %v1469_v44, %v555_v34 }
 0x1f0   :  { %637 = vmax.xlane.f32.xlu1 %v1571_v33 }
 0x1f3   :  { %v1071_v37 = vpop.f32.mrb[24].mxu1  ;;  %631 = vmax.xlane.f32.xlu0 %v1576_v35 }
 0x1f4   :  { %v568_v38 = vpop.f32.mrb[25].mxu1  ;;  %633 = vmax.xlane.f32.xlu1 %v1579_v36  ;;  %v1591_v43 = vadd.f32 %v1071_v37, %v1469_v44 }
 0x1f5   :  { %v1584_v39 = vadd.f32 %v1469_v44, %v568_v38  ;;  %v1072_v40 = vpop.f32.mrb[26].mxu1 }
 0x1f6   :  { %v571_v41 = vpop.f32.mrb[27].mxu1  ;;  %v1595_v45 = vadd.f32 %v1072_v40, %v1469_v44 }
 0x1f7   :  { %v1587_v42 = vadd.f32 %v1469_v44, %v571_v41  ;;  %639 = vmax.xlane.f32.xlu0 %v1584_v39 }
 0x1f9   :  { %641 = vmax.xlane.f32.xlu1 %v1587_v42 }
 0x1fb   :  { %643 = vmax.xlane.f32.xlu0 %v1591_v43 }
 0x1fd   :  { %645 = vmax.xlane.f32.xlu1 %v1595_v45 }
 0x24b   :  { %v588_v47 = vpop.xlane.xlu1 %587 }
 0x24c   :  { %v649_v58 = vsub.f32 %v1472_v46, %v588_v47  ;;  %v584_v49 = vpop.xlane.xlu0 %583 }
 0x24d   :  { %v647_v52 = vsub.f32 %v1475_v48, %v584_v49 }
 0x24e   :  { %v683_v54 = vmul.f32 1.442695, %v649_v58 }
 0x24f   :  { %v679_v55 = vmul.f32 1.442695, %v647_v52  ;;  %v590_v57 = vpop.xlane.xlu1 %589 }
 0x250   :  { %1102 = vpow2.f32 %v683_v54  ;;  %v650_v61 = vsub.f32 %v1480_v50, %v590_v57  ;;  %v586_v63 = vpop.xlane.xlu0 %585 }
 0x251   :  { %v648_v44 = vsub.f32 %v1483_v51, %v586_v63  ;;  %1104 = vpow2.f32 %v679_v55 }
 0x252   :  { %v685_v0 = vmul.f32 1.442695, %v650_v61 }
 0x253   :  { %v681_v2 = vmul.f32 1.442695, %v648_v44 }
 0x254   :  { %1106 = vpow2.f32 %v685_v0  ;;  %v596_v5 = vpop.xlane.xlu0 %595 }
 0x255   :  { %v653_v7 = vsub.f32 %v1488_v53, %v596_v5  ;;  %v598_v46 = vpop.xlane.xlu1 %597  ;;  %1108 = vpow2.f32 %v681_v2 }
 0x256   :  { %v654_v8 = vsub.f32 %v1491_v56, %v598_v46 }
 0x257   :  { %v691_v48 = vmul.f32 1.442695, %v653_v7 }
 0x258   :  { %v693_v10 = vmul.f32 1.442695, %v654_v8  ;;  %v592_v13 = vpop.xlane.xlu0 %591 }
 0x259   :  { %1110 = vpow2.f32 %v691_v48  ;;  %v651_v50 = vsub.f32 %v1496_v59, %v592_v13  ;;  %v594_v15 = vpop.xlane.xlu1 %593 }
 0x25a   :  { %v1606_v16 = vpop.eup %1102  ;;  %v652_v51 = vsub.f32 %v1499_v60, %v594_v15  ;;  %1112 = vpow2.f32 %v693_v10 }
 0x25b   :  { %v687_v18 = vmul.f32 1.442695, %v651_v50  ;;  %747 = vadd.xlane.f32.xlu0 %v1606_v16  ;;  %v1610_v23 = vpop.eup %1104 }
 0x25c   :  { %v689_v53 = vmul.f32 1.442695, %v652_v51  ;;  %v604_v21 = vpop.xlane.xlu0 %603 }
 0x25d   :  { %1114 = vpow2.f32 %v687_v18  ;;  %v657_v56 = vsub.f32 %v1503_v62, %v604_v21  ;;  %v606_v24 = vpop.xlane.xlu1 %605 }
 0x25e   :  { %v1613_v26 = vpop.eup %1106  ;;  %v658_v59 = vsub.f32 %v1507_v1, %v606_v24  ;;  %1116 = vpow2.f32 %v689_v53 }
 0x25f   :  { %v699_v29 = vmul.f32 1.442695, %v657_v56  ;;  %749 = vadd.xlane.f32.xlu1 %v1613_v26  ;;  %743 = vadd.xlane.f32.xlu0 %v1610_v23  ;;  %v1619_v37 = vpop.eup %1108 }
 0x260   :  { %v701_v60 = vmul.f32 1.442695, %v658_v59  ;;  %v600_v31 = vpop.xlane.xlu0 %599 }
 0x261   :  { %1118 = vpow2.f32 %v699_v29  ;;  %v655_v32 = vsub.f32 %v1512_v3, %v600_v31  ;;  %v602_v34 = vpop.xlane.xlu1 %601 }
 0x262   :  { %v656_v62 = vsub.f32 %v1515_v4, %v602_v34  ;;  %1120 = vpow2.f32 %v701_v60 }
 0x263   :  { %v1622_v38 = vpop.eup %1110  ;;  %v695_v40 = vmul.f32 1.442695, %v655_v32  ;;  %745 = vadd.xlane.f32.xlu1 %v1619_v37 }
 0x264   :  { %v697_v1 = vmul.f32 1.442695, %v656_v62  ;;  %755 = vadd.xlane.f32.xlu0 %v1622_v38  ;;  %v612_v41 = vpop.xlane.xlu0 %611  ;;  %v1627_v3 = vpop.eup %1112 }
 0x265   :  { %1122 = vpow2.f32 %v695_v40  ;;  %v661_v47 = vsub.f32 %v1519_v6, %v612_v41  ;;  %v614_v58 = vpop.xlane.xlu1 %613 }
 0x266   :  { %v662_v49 = vsub.f32 %v1523_v9, %v614_v58  ;;  %1124 = vpow2.f32 %v697_v1 }
 0x267   :  { %v1630_v52 = vpop.eup %1114  ;;  %v707_v4 = vmul.f32 1.442695, %v661_v47  ;;  %757 = vadd.xlane.f32.xlu1 %v1627_v3 }
 0x268   :  { %v709_v54 = vmul.f32 1.442695, %v662_v49  ;;  %751 = vadd.xlane.f32.xlu0 %v1630_v52  ;;  %v608_v55 = vpop.xlane.xlu0 %607  ;;  %v1635_v6 = vpop.eup %1116 }
 0x269   :  { %1126 = vpow2.f32 %v707_v4  ;;  %v659_v57 = vsub.f32 %v1528_v11, %v608_v55  ;;  %v610_v61 = vpop.xlane.xlu1 %609 }
 0x26a   :  { %v660_v63 = vsub.f32 %v1531_v12, %v610_v61  ;;  %1128 = vpow2.f32 %v709_v54 }
 0x26b   :  { %v1638_v44 = vpop.eup %1118  ;;  %v703_v9 = vmul.f32 1.442695, %v659_v57  ;;  %753 = vadd.xlane.f32.xlu1 %v1635_v6 }
 0x26c   :  { %v705_v0 = vmul.f32 1.442695, %v660_v63  ;;  %763 = vadd.xlane.f32.xlu0 %v1638_v44  ;;  %v620_v2 = vpop.xlane.xlu0 %619  ;;  %v1643_v11 = vpop.eup %1120 }
 0x26d   :  { %1130 = vpow2.f32 %v703_v9  ;;  %v665_v5 = vsub.f32 %v1535_v14, %v620_v2  ;;  %v622_v7 = vpop.xlane.xlu1 %621 }
 0x26e   :  { %v666_v46 = vsub.f32 %v1539_v17, %v622_v7  ;;  %1132 = vpow2.f32 %v705_v0 }
 0x26f   :  { %v1646_v8 = vpop.eup %1122  ;;  %v715_v12 = vmul.f32 1.442695, %v665_v5  ;;  %765 = vadd.xlane.f32.xlu1 %v1643_v11 }
 0x270   :  { %v717_v48 = vmul.f32 1.442695, %v666_v46  ;;  %759 = vadd.xlane.f32.xlu0 %v1646_v8  ;;  %v616_v10 = vpop.xlane.xlu0 %615  ;;  %v1651_v14 = vpop.eup %1124 }
 0x271   :  { %1134 = vpow2.f32 %v715_v12  ;;  %v663_v13 = vsub.f32 %v1544_v19, %v616_v10  ;;  %v618_v50 = vpop.xlane.xlu1 %617 }
 0x272   :  { %v664_v15 = vsub.f32 %v1547_v20, %v618_v50  ;;  %1136 = vpow2.f32 %v717_v48 }
 0x273   :  { %v1654_v51 = vpop.eup %1126  ;;  %v711_v17 = vmul.f32 1.442695, %v663_v13  ;;  %761 = vadd.xlane.f32.xlu1 %v1651_v14 }
 0x274   :  { %v713_v18 = vmul.f32 1.442695, %v664_v15  ;;  %771 = vadd.xlane.f32.xlu0 %v1654_v51  ;;  %v628_v53 = vpop.xlane.xlu0 %627  ;;  %v1659_v19 = vpop.eup %1128 }
 0x275   :  { %1138 = vpow2.f32 %v711_v17  ;;  %v669_v21 = vsub.f32 %v1551_v22, %v628_v53  ;;  %v630_v56 = vpop.xlane.xlu1 %629 }
 0x276   :  { %v670_v24 = vsub.f32 %v1555_v25, %v630_v56  ;;  %1140 = vpow2.f32 %v713_v18 }
 0x277   :  { %v1662_v59 = vpop.eup %1130  ;;  %v723_v20 = vmul.f32 1.442695, %v669_v21  ;;  %773 = vadd.xlane.f32.xlu1 %v1659_v19 }
 0x278   :  { %v725_v29 = vmul.f32 1.442695, %v670_v24  ;;  %767 = vadd.xlane.f32.xlu0 %v1662_v59  ;;  %v624_v60 = vpop.xlane.xlu0 %623  ;;  %v1667_v22 = vpop.eup %1132 }
 0x279   :  { %1142 = vpow2.f32 %v723_v20  ;;  %v667_v31 = vsub.f32 %v1560_v27, %v624_v60  ;;  %v626_v32 = vpop.xlane.xlu1 %625 }
 0x27a   :  { %v668_v34 = vsub.f32 %v1563_v28, %v626_v32  ;;  %1144 = vpow2.f32 %v725_v29 }
 0x27b   :  { %v1670_v62 = vpop.eup %1134  ;;  %v719_v25 = vmul.f32 1.442695, %v667_v31  ;;  %769 = vadd.xlane.f32.xlu1 %v1667_v22 }
 0x27c   :  { %v721_v40 = vmul.f32 1.442695, %v668_v34  ;;  %779 = vadd.xlane.f32.xlu0 %v1670_v62  ;;  %v636_v1 = vpop.xlane.xlu0 %635  ;;  %v1675_v27 = vpop.eup %1136 }
 0x27d   :  { %1146 = vpow2.f32 %v719_v25  ;;  %v673_v41 = vsub.f32 %v1567_v30, %v636_v1  ;;  %v638_v47 = vpop.xlane.xlu1 %637 }
 0x27e   :  { %v674_v58 = vsub.f32 %v1571_v33, %v638_v47  ;;  %1148 = vpow2.f32 %v721_v40 }
 0x27f   :  { %v1678_v49 = vpop.eup %1138  ;;  %v731_v28 = vmul.f32 1.442695, %v673_v41  ;;  %781 = vadd.xlane.f32.xlu1 %v1675_v27 }
 0x280   :  { %v733_v4 = vmul.f32 1.442695, %v674_v58  ;;  %775 = vadd.xlane.f32.xlu0 %v1678_v49  ;;  %v632_v54 = vpop.xlane.xlu0 %631  ;;  %v1683_v30 = vpop.eup %1140 }
 0x281   :  { %1150 = vpow2.f32 %v731_v28  ;;  %v671_v55 = vsub.f32 %v1576_v35, %v632_v54  ;;  %v634_v57 = vpop.xlane.xlu1 %633 }
 0x282   :  { %v672_v61 = vsub.f32 %v1579_v36, %v634_v57  ;;  %1152 = vpow2.f32 %v733_v4 }
 0x283   :  { %v1686_v63 = vpop.eup %1142  ;;  %v727_v33 = vmul.f32 1.442695, %v671_v55  ;;  %777 = vadd.xlane.f32.xlu1 %v1683_v30 }
 0x284   :  { %v729_v9 = vmul.f32 1.442695, %v672_v61  ;;  %787 = vadd.xlane.f32.xlu0 %v1686_v63  ;;  %v640_v0 = vpop.xlane.xlu0 %639  ;;  %v1691_v5 = vpop.eup %1144 }
 0x285   :  { %1154 = vpow2.f32 %v727_v33  ;;  %v675_v2 = vsub.f32 %v1584_v39, %v640_v0 }
 0x286   :  { %v642_v35 = vpop.xlane.xlu1 %641  ;;  %1156 = vpow2.f32 %v729_v9 }
 0x287   :  { %v1693_v7 = vpop.eup %1146  ;;  %v735_v46 = vmul.f32 1.442695, %v675_v2  ;;  %v676_v36 = vsub.f32 %v1587_v42, %v642_v35  ;;  %789 = vadd.xlane.f32.xlu1 %v1691_v5 }
 0x288   :  { %783 = vadd.xlane.f32.xlu0 %v1693_v7  ;;  %v644_v12 = vpop.xlane.xlu0 %643  ;;  %v1699_v13 = vpop.eup %1148 }
 0x289   :  { %1158 = vpow2.f32 %v735_v46  ;;  %v737_v48 = vmul.f32 1.442695, %v676_v36  ;;  %v677_v10 = vsub.f32 %v1591_v43, %v644_v12 }
 0x28a   :  { %v646_v39 = vpop.xlane.xlu1 %645 }
 0x28b   :  { %v1701_v50 = vpop.eup %1150  ;;  %1160 = vpow2.f32 %v737_v48  ;;  %v739_v15 = vmul.f32 1.442695, %v677_v10  ;;  %v678_v17 = vsub.f32 %v1595_v45, %v646_v39  ;;  %785 = vadd.xlane.f32.xlu1 %v1699_v13 }
 0x28c   :  { %795 = vadd.xlane.f32.xlu0 %v1701_v50  ;;  %v1706_v18 = vpop.eup %1152 }
 0x28d   :  { %1162 = vpow2.f32 %v739_v15  ;;  %v741_v42 = vmul.f32 1.442695, %v678_v17 }
 0x28f   :  { %v1708_v53 = vpop.eup %1154  ;;  %1164 = vpow2.f32 %v741_v42  ;;  %797 = vadd.xlane.f32.xlu1 %v1706_v18 }
 0x290   :  { %791 = vadd.xlane.f32.xlu0 %v1708_v53  ;;  %v1712_v43 = vpop.eup %1156 }
 0x293   :  { %v1714_v21 = vpop.eup %1158  ;;  %793 = vadd.xlane.f32.xlu1 %v1712_v43 }
 0x294   :  { %799 = vadd.xlane.f32.xlu0 %v1714_v21 }
 0x295   :  { %v1718_v45 = vpop.eup %1160 }
 0x297   :  { %v1720_v56 = vpop.eup %1162  ;;  %801 = vadd.xlane.f32.xlu1 %v1718_v45 }
 0x298   :  { %803 = vadd.xlane.f32.xlu0 %v1720_v56 }
 0x299   :  { %v1724_v24 = vpop.eup %1164 }
 0x29b   :  { %805 = vadd.xlane.f32.xlu1 %v1724_v24 }
 0x2e8   :  { %v748_v20 = vpop.xlane.xlu0 %747 }
 0x2e9   :  { %1166 = vrcp.f32 %v748_v20 }
 0x2ec   :  { %v750_v29 = vpop.xlane.xlu1 %749  ;;  %v744_v60 = vpop.xlane.xlu0 %743 }
 0x2ed   :  { %1168 = vrcp.f32 %v750_v29 }
 0x2ee   :  { %1170 = vrcp.f32 %v744_v60 }
 0x2f0   :  { %v746_v31 = vpop.xlane.xlu1 %745 }
 0x2f1   :  { %1172 = vrcp.f32 %v746_v31  ;;  %v756_v32 = vpop.xlane.xlu0 %755 }
 0x2f2   :  { %1174 = vrcp.f32 %v756_v32 }
 0x2f3   :  { %v1167_v34 = vpop.eup %1166 }
 0x2f4   :  { %v812_v25 = vmul.f32 %v1167_v34, %v1606_v16  ;;  %v758_v40 = vpop.xlane.xlu1 %757 }
 0x2f5   :  { %1176 = vrcp.f32 %v758_v40  ;;  %v752_v1 = vpop.xlane.xlu0 %751 }
 0x2f6   :  { %873 = vst [vmem:[#allocation2 + $0x10] sm:$0xff] %v812_v25  ;;  %1178 = vrcp.f32 %v752_v1 }
 0x2f7   :  { %v1169_v41 = vpop.eup %1168 }
 0x2f8   :  { %v1171_v47 = vpop.eup %1170  ;;  %v814_v58 = vmul.f32 %v1169_v41, %v1613_v26  ;;  %v754_v28 = vpop.xlane.xlu1 %753 }
 0x2f9   :  { %v808_v4 = vmul.f32 %v1171_v47, %v1610_v23  ;;  %1180 = vrcp.f32 %v754_v28  ;;  %v764_v54 = vpop.xlane.xlu0 %763 }
 0x2fa   :  { %874 = vst [vmem:[#allocation2 + $0x18] sm:$0xff] %v814_v58  ;;  %1182 = vrcp.f32 %v764_v54 }
 0x2fb   :  { %v1173_v55 = vpop.eup %1172  ;;  %871 = vst [vmem:[#allocation2] sm:$0xff] %v808_v4 }
 0x2fc   :  { %v1175_v57 = vpop.eup %1174  ;;  %v810_v16 = vmul.f32 %v1173_v55, %v1619_v37  ;;  %v766_v61 = vpop.xlane.xlu1 %765 }
 0x2fd   :  { %v820_v33 = vmul.f32 %v1175_v57, %v1622_v38  ;;  %1184 = vrcp.f32 %v766_v61  ;;  %v760_v9 = vpop.xlane.xlu0 %759 }
 0x2fe   :  { %872 = vst [vmem:[#allocation2 + $0x8] sm:$0xff] %v810_v16  ;;  %1186 = vrcp.f32 %v760_v9 }
 0x2ff   :  { %v1177_v26 = vpop.eup %1176  ;;  %877 = vst [vmem:[#allocation2 + $0x30] sm:$0xff] %v820_v33 }
 0x300   :  { %v1179_v0 = vpop.eup %1178  ;;  %v822_v23 = vmul.f32 %v1177_v26, %v1627_v3  ;;  %v762_v2 = vpop.xlane.xlu1 %761 }
 0x301   :  { %v816_v35 = vmul.f32 %v1179_v0, %v1630_v52  ;;  %1188 = vrcp.f32 %v762_v2  ;;  %v772_v46 = vpop.xlane.xlu0 %771 }
 0x302   :  { %878 = vst [vmem:[#allocation2 + $0x38] sm:$0xff] %v822_v23  ;;  %1190 = vrcp.f32 %v772_v46 }
 0x303   :  { %v1181_v37 = vpop.eup %1180  ;;  %875 = vst [vmem:[#allocation2 + $0x20] sm:$0xff] %v816_v35 }
 0x304   :  { %v1183_v36 = vpop.eup %1182  ;;  %v818_v38 = vmul.f32 %v1181_v37, %v1635_v6  ;;  %v774_v12 = vpop.xlane.xlu1 %773 }
 0x305   :  { %v828_v48 = vmul.f32 %v1183_v36, %v1638_v44  ;;  %1192 = vrcp.f32 %v774_v12  ;;  %v768_v10 = vpop.xlane.xlu0 %767 }
 0x306   :  { %876 = vst [vmem:[#allocation2 + $0x28] sm:$0xff] %v818_v38  ;;  %1194 = vrcp.f32 %v768_v10 }
 0x307   :  { %v1185_v3 = vpop.eup %1184  ;;  %881 = vst [vmem:[#allocation2 + $0x50] sm:$0xff] %v828_v48 }
 0x308   :  { %v1187_v39 = vpop.eup %1186  ;;  %v830_v52 = vmul.f32 %v1185_v3, %v1643_v11  ;;  %v770_v15 = vpop.xlane.xlu1 %769 }
 0x309   :  { %v824_v17 = vmul.f32 %v1187_v39, %v1646_v8  ;;  %1196 = vrcp.f32 %v770_v15  ;;  %v780_v42 = vpop.xlane.xlu0 %779 }
 0x30a   :  { %882 = vst [vmem:[#allocation2 + $0x58] sm:$0xff] %v830_v52  ;;  %1198 = vrcp.f32 %v780_v42 }
 0x30b   :  { %v1189_v6 = vpop.eup %1188  ;;  %879 = vst [vmem:[#allocation2 + $0x40] sm:$0xff] %v824_v17 }
 0x30c   :  { %v1191_v20 = vpop.eup %1190  ;;  %v826_v44 = vmul.f32 %v1189_v6, %v1651_v14  ;;  %v782_v29 = vpop.xlane.xlu1 %781 }
 0x30d   :  { %v836_v60 = vmul.f32 %v1191_v20, %v1654_v51  ;;  %1200 = vrcp.f32 %v782_v29  ;;  %v776_v31 = vpop.xlane.xlu0 %775 }
 0x30e   :  { %880 = vst [vmem:[#allocation2 + $0x48] sm:$0xff] %v826_v44  ;;  %1202 = vrcp.f32 %v776_v31 }
 0x30f   :  { %v1193_v11 = vpop.eup %1192  ;;  %885 = vst [vmem:[#allocation2 + $0x70] sm:$0xff] %v836_v60 }
 0x310   :  { %v1195_v32 = vpop.eup %1194  ;;  %v838_v8 = vmul.f32 %v1193_v11, %v1659_v19  ;;  %v778_v34 = vpop.xlane.xlu1 %777 }
 0x311   :  { %v832_v25 = vmul.f32 %v1195_v32, %v1662_v59  ;;  %1204 = vrcp.f32 %v778_v34  ;;  %v788_v40 = vpop.xlane.xlu0 %787 }
 0x312   :  { %886 = vst [vmem:[#allocation2 + $0x78] sm:$0xff] %v838_v8  ;;  %1206 = vrcp.f32 %v788_v40 }
 0x313   :  { %v1197_v14 = vpop.eup %1196  ;;  %883 = vst [vmem:[#allocation2 + $0x60] sm:$0xff] %v832_v25 }
 0x314   :  { %v1199_v1 = vpop.eup %1198  ;;  %v834_v51 = vmul.f32 %v1197_v14, %v1667_v22  ;;  %v790_v41 = vpop.xlane.xlu1 %789 }
 0x315   :  { %v844_v47 = vmul.f32 %v1199_v1, %v1670_v62  ;;  %1208 = vrcp.f32 %v790_v41  ;;  %v784_v58 = vpop.xlane.xlu0 %783 }
 0x316   :  { %884 = vst [vmem:[#allocation2 + $0x68] sm:$0xff] %v834_v51  ;;  %1210 = vrcp.f32 %v784_v58 }
 0x317   :  { %v1201_v19 = vpop.eup %1200  ;;  %889 = vst [vmem:[#allocation2 + $0x90] sm:$0xff] %v844_v47 }
 0x318   :  { %v1203_v28 = vpop.eup %1202  ;;  %v846_v59 = vmul.f32 %v1201_v19, %v1675_v27  ;;  %v786_v4 = vpop.xlane.xlu1 %785 }
 0x319   :  { %v840_v54 = vmul.f32 %v1203_v28, %v1678_v49  ;;  %1212 = vrcp.f32 %v786_v4  ;;  %v796_v55 = vpop.xlane.xlu0 %795 }
 0x31a   :  { %890 = vst [vmem:[#allocation2 + $0x98] sm:$0xff] %v846_v59  ;;  %1214 = vrcp.f32 %v796_v55 }
 0x31b   :  { %v1205_v22 = vpop.eup %1204  ;;  %887 = vst [vmem:[#allocation2 + $0x80] sm:$0xff] %v840_v54 }
 0x31c   :  { %v1207_v57 = vpop.eup %1206  ;;  %v842_v62 = vmul.f32 %v1205_v22, %v1683_v30  ;;  %v798_v16 = vpop.xlane.xlu1 %797 }
 0x31d   :  { %v852_v61 = vmul.f32 %v1207_v57, %v1686_v63  ;;  %1216 = vrcp.f32 %v798_v16  ;;  %v792_v33 = vpop.xlane.xlu0 %791 }
 0x31e   :  { %888 = vst [vmem:[#allocation2 + $0x88] sm:$0xff] %v842_v62  ;;  %1218 = vrcp.f32 %v792_v33 }
 0x31f   :  { %v1209_v27 = vpop.eup %1208  ;;  %893 = vst [vmem:[#allocation2 + $0xb0] sm:$0xff] %v852_v61 }
 0x320   :  { %v1211_v9 = vpop.eup %1210  ;;  %v854_v49 = vmul.f32 %v1209_v27, %v1691_v5  ;;  %v794_v26 = vpop.xlane.xlu1 %793 }
 0x321   :  { %v848_v0 = vmul.f32 %v1211_v9, %v1693_v7  ;;  %1220 = vrcp.f32 %v794_v26  ;;  %v800_v23 = vpop.xlane.xlu0 %799 }
 0x322   :  { %894 = vst [vmem:[#allocation2 + $0xb8] sm:$0xff] %v854_v49  ;;  %1222 = vrcp.f32 %v800_v23 }
 0x323   :  { %v1213_v30 = vpop.eup %1212  ;;  %891 = vst [vmem:[#allocation2 + $0xa0] sm:$0xff] %v848_v0 }
 0x324   :  { %v1215_v2 = vpop.eup %1214  ;;  %v850_v63 = vmul.f32 %v1213_v30, %v1699_v13  ;;  %v802_v35 = vpop.xlane.xlu1 %801 }
 0x325   :  { %v860_v46 = vmul.f32 %v1215_v2, %v1701_v50  ;;  %1224 = vrcp.f32 %v802_v35  ;;  %v804_v37 = vpop.xlane.xlu0 %803 }
 0x326   :  { %892 = vst [vmem:[#allocation2 + $0xa8] sm:$0xff] %v850_v63  ;;  %1226 = vrcp.f32 %v804_v37 }
 0x327   :  { %v1217_v5 = vpop.eup %1216  ;;  %897 = vst [vmem:[#allocation2 + $0xd0] sm:$0xff] %v860_v46 }
 0x328   :  { %v1219_v36 = vpop.eup %1218  ;;  %v862_v7 = vmul.f32 %v1217_v5, %v1706_v18  ;;  %v806_v38 = vpop.xlane.xlu1 %805 }
 0x329   :  { %v856_v12 = vmul.f32 %v1219_v36, %v1708_v53  ;;  %1228 = vrcp.f32 %v806_v38 }
 0x32a   :  { %898 = vst [vmem:[#allocation2 + $0xd8] sm:$0xff] %v862_v7 }
 0x32b   :  { %v1221_v48 = vpop.eup %1220  ;;  %895 = vst [vmem:[#allocation2 + $0xc0] sm:$0xff] %v856_v12 }
 0x32c   :  { %v1223_v13 = vpop.eup %1222  ;;  %v858_v10 = vmul.f32 %v1221_v48, %v1712_v43 }
 0x32d   :  { %v864_v50 = vmul.f32 %v1223_v13, %v1714_v21 }
 0x32e   :  { %896 = vst [vmem:[#allocation2 + $0xc8] sm:$0xff] %v858_v10 }
 0x32f   :  { %v1225_v3 = vpop.eup %1224  ;;  %899 = vst [vmem:[#allocation2 + $0xe0] sm:$0xff] %v864_v50 }
 0x330   :  { %v1227_v39 = vpop.eup %1226  ;;  %v866_v52 = vmul.f32 %v1225_v3, %v1718_v45 }
 0x331   :  { %v868_v18 = vmul.f32 %v1227_v39, %v1720_v56 }
 0x332   :  { %900 = vst [vmem:[#allocation2 + $0xe8] sm:$0xff] %v866_v52 }
 0x333   :  { %v1229_v53 = vpop.eup %1228  ;;  %901 = vst [vmem:[#allocation2 + $0xf0] sm:$0xff] %v868_v18 }
 0x334   :  { %v870_v15 = vmul.f32 %v1229_v53, %v1724_v24 }
 0x336   :  { %902 = vst [vmem:[#allocation2 + $0xf8] sm:$0xff] %v870_v15 }
 0x337   :  { %1241 = shalt.err (!%p1238_p4)
}
 0x338   :  { %s1242_s29 = scalar_lea.hbm %s1776_s5, 4096 }
 0x339   :  { %p1243_p5 = scmp.ne.s32.totalorder %s1776_s5, %s1242_s29  ;;  %p1246_p6 = scmp.lt.u32.totalorder %s1242_s29, %s1776_s5 }
 0x33b   :  { %p1248_p7 = pnand %p1246_p6, %p1243_p5 }
 0x33d   :  { %1251 = shalt.err (!%p1248_p7)
}
 0x33e   :  { %s1255_s8 = smov 128   ;;  %s1256_s9 = smov 8  }
 0x33f   :  { %914 = dma.vmem_to_hbm [thread:$0]  %s909_s4, 4096, %s1776_s5, [#allocation3], %s1255_s8, %s1255_s8, %s1256_s9  }
 0x340   :  { %1252 = dma.done.wait [#allocation3], 4096  }
 0x341   :  { %1253 = vsyncadd [#allocation3], 4294963200 }
 0x342   :  { %918 = vsyncpa [#allocation3], 1 }

</bundles_post_ra>
